<compile_context>
chip_gen: v7x
topology: tpu7x:2x2x1
jax: 0.10.0
libtpu: 0.0.40
codegen_flags: <defaults>
</compile_context>

<pallas_src>
import functools
import math

import jax
import jax.numpy as jnp
from jax import lax
from jax.experimental import pallas as pl
from jax.experimental.pallas import tpu as pltpu

_LANE = 128
_SUBLANE = 8
_MAX_FOLDED_D = 512          # cap on g*D when folding rows into the lane dim


def _layer_norm_kernel(*refs, eps, d, fold, has_weight, has_bias, packed):
    """refs = (x, [P], [wb | w | b], out). All flags/sizes are Python-static."""
    it = iter(refs)
    x_ref = next(it)
    p_ref = next(it) if fold > 1 else None
    wb_ref = next(it) if packed else None
    w_ref = next(it) if (has_weight and not packed) else None
    b_ref = next(it) if (has_bias and not packed) else None
    o_ref = next(it)

    x = x_ref[...].astype(jnp.float32)              # (rt, d_lane)
    if fold > 1:
        # Block-diagonal averaging matrix P (d_lane, d_lane) with
        # P[i, j] = 1/d iff i//d == j//d.  One MXU matmul both reduces each
        # d-sized group and broadcasts the result back to full lane width, so
        # the kernel stays 2D and the output store stays lane-dense.
        p = p_ref[...]
        mean = jnp.dot(x, p, preferred_element_type=jnp.float32)
        xc = x - mean                               # x dead after this
        var = jnp.dot(xc * xc, p, preferred_element_type=jnp.float32)
    else:
        inv_d = 1.0 / d
        mean = jnp.sum(x, axis=-1, keepdims=True) * inv_d
        xc = x - mean                               # x dead after this
        var = jnp.sum(xc * xc, axis=-1, keepdims=True) * inv_d

    y = xc * lax.rsqrt(var + eps)                   # EUP rsqrt; xc dead after

    if packed:
        wb = wb_ref[...].astype(jnp.float32)        # (2, d_lane)
        y = y * wb[0:1, :] + wb[1:2, :]
    else:
        if has_weight:
            y = y * w_ref[...].astype(jnp.float32)
        if has_bias:
            y = y + b_ref[...].astype(jnp.float32)

    o_ref[...] = y.astype(o_ref.dtype)


def _vmem_limits():
    """Return (block-sizing budget, vmem_limit_bytes) derived from the chip."""
    cap = 64 * 1024 * 1024                          # v7x per-core VMEM (smallest)
    try:
        info_cap = int(pltpu.get_tpu_info().vmem_capacity_bytes)
        if info_cap > 0:
            cap = info_cap
    except Exception:
        pass
    # Explicit scoped limit: 48 MiB on v7x (64 MiB physical), 64 MiB on
    # v5e/v6e (128 MiB physical).  Blocks are sized against 75% of the limit
    # so the fp32-temporary estimate has headroom.
    limit = min(cap * 3 // 4, 64 * 1024 * 1024)
    sizing = limit * 3 // 4
    return sizing, limit


def _choose_row_tile(rows, per_row_bytes, budget_bytes):
    """Largest row tile whose full per-step VMEM footprint fits the budget."""
    rt = max(1, budget_bytes // max(1, per_row_bytes))
    # Keep the grid at >= 2 (typically >= 4) steps whenever rows allow it:
    # the pipeline needs something to overlap, and v7x's two TensorCores only
    # both run if the "parallel" row axis has more than one step.
    if rows > _SUBLANE:
        rt = min(rt, pl.cdiv(rows, 4))
    if rt >= rows:
        return rows                                  # full extent: always legal
    return max(_SUBLANE, (rt // _SUBLANE) * _SUBLANE)


def llmc_layer_norm(x, weight, bias, eps, normalized_shape):
    """LayerNorm over the trailing `normalized_shape` dims via a Pallas TPU kernel.

    Matches torch.nn.functional.layer_norm(x, normalized_shape, weight, bias, eps).
    weight / bias may be None.
    """
    normalized_shape = tuple(int(s) for s in normalized_shape)
    n_norm = len(normalized_shape)
    assert x.shape[x.ndim - n_norm:] == normalized_shape, (
        "trailing dims of x must equal normalized_shape")

    d = math.prod(normalized_shape)
    lead = x.shape[:x.ndim - n_norm]
    rows = math.prod(lead) if lead else 1
    orig_shape, orig_dtype = x.shape, x.dtype

    has_weight = weight is not None
    has_bias = bias is not None
    packed = has_weight and has_bias

    # Lane folding: if D is not lane-aligned, view `fold` consecutive rows as
    # one lane-dense row of width fold*D (contiguous reshape, no HBM copy).
    fold = 1
    if d % _LANE != 0:
        g = _LANE // math.gcd(d, _LANE)
        if g > 1 and rows % g == 0 and d * g <= _MAX_FOLDED_D:
            fold = g
    d_lane = d * fold
    rows_f = rows // fold

    x2d = x.reshape(rows_f, d_lane)

    inputs = [x2d]
    if fold > 1:
        group = jnp.arange(d_lane, dtype=jnp.int32) // d
        p_mat = (group[:, None] == group[None, :]).astype(jnp.float32) / float(d)
        inputs.append(p_mat)

    w_lane = b_lane = None
    if has_weight:
        w_lane = weight.reshape(1, d)
        if fold > 1:
            w_lane = jnp.tile(w_lane, (1, fold))
    if has_bias:
        b_lane = bias.reshape(1, d)
        if fold > 1:
            b_lane = jnp.tile(b_lane, (1, fold))

    if packed:
        wb_dtype = jnp.promote_types(w_lane.dtype, b_lane.dtype)
        inputs.append(jnp.concatenate(
            [w_lane.astype(wb_dtype), b_lane.astype(wb_dtype)], axis=0))
    elif has_weight:
        inputs.append(w_lane)
    elif has_bias:
        inputs.append(b_lane)

    # VMEM footprint per step: double-buffered input + output blocks plus
    # ~3 block-sized fp32 temporaries created inside the kernel.
    sizing, vmem_limit = _vmem_limits()
    itemsize = jnp.dtype(orig_dtype).itemsize
    per_row_bytes = d_lane * (4 * itemsize + 3 * 4)
    row_tile = _choose_row_tile(rows_f, per_row_bytes, sizing)
    grid = (pl.cdiv(rows_f, row_tile),)   # partial last block: writes masked

    in_specs = [pl.BlockSpec((row_tile, d_lane), lambda i: (i, 0))]
    for arr in inputs[1:]:
        in_specs.append(pl.BlockSpec(arr.shape, lambda i: (0, 0)))
    out_spec = pl.BlockSpec((row_tile, d_lane), lambda i: (i, 0))

    kernel = functools.partial(
        _layer_norm_kernel, eps=float(eps), d=d, fold=fold,
        has_weight=has_weight, has_bias=has_bias, packed=packed)

    out2d = pl.pallas_call(
        kernel,
        out_shape=jax.ShapeDtypeStruct((rows_f, d_lane), orig_dtype),
        grid_spec=pl.GridSpec(
            grid=grid,
            in_specs=in_specs,
            out_specs=out_spec,
        ),
        compiler_params=pltpu.CompilerParams(
            dimension_semantics=("parallel",),
            vmem_limit_bytes=int(vmem_limit),
        ),
    )(*inputs)

    return out2d.reshape(orig_shape)


def llmc_layer_norm_ref(x, weight, bias, eps, normalized_shape):
    """Pure-JAX reference matching F.layer_norm semantics."""
    n_norm = len(normalized_shape)
    axes = tuple(range(x.ndim - n_norm, x.ndim))
    xf = x.astype(jnp.float32)
    mean = jnp.mean(xf, axis=axes, keepdims=True)
    var = jnp.mean((xf - mean) ** 2, axis=axes, keepdims=True)
    y = (xf - mean) / jnp.sqrt(var + eps)
    if weight is not None:
        y = y * weight.astype(jnp.float32)
    if bias is not None:
        y = y + bias.astype(jnp.float32)
    return y.astype(x.dtype)


if __name__ == "__main__":
    key = jax.random.PRNGKey(0)
    k1, k2, k3, k4 = jax.random.split(key, 4)
    eps = 1e-5

    # Case 1: LLM-style LayerNorm with narrow hidden (exercises the lane-fold
    # matmul path): batch=2, seq=8, hidden=32.
    B, S, H = 2, 8, 32
    x = jax.random.normal(k1, (B, S, H), dtype=jnp.float32)
    weight = 1.0 + 0.1 * jax.random.normal(k2, (H,), dtype=jnp.float32)
    bias = 0.1 * jax.random.normal(k3, (H,), dtype=jnp.float32)

    out = jax.block_until_ready(llmc_layer_norm(x, weight, bias, eps, (H,)))
    ref = llmc_layer_norm_ref(x, weight, bias, eps, (H,))
    assert out.shape == x.shape and out.dtype == x.dtype
    assert jnp.max(jnp.abs(out - ref)) < 1e-5

    # Case 1b: bias=None path (LlmcLayerNorm allows a missing bias buffer).
    out_nb = jax.block_until_ready(llmc_layer_norm(x, weight, None, eps, (H,)))
    ref_nb = llmc_layer_norm_ref(x, weight, None, eps, (H,))
    assert jnp.max(jnp.abs(out_nb - ref_nb)) < 1e-5

    # Case 2: lane-aligned hidden (exercises the plain reduction path and a
    # multi-step "parallel" grid).
    H2 = 256
    x2 = jax.random.normal(k4, (B, S, H2), dtype=jnp.float32)
    w2 = 1.0 + 0.1 * jax.random.normal(k2, (H2,), dtype=jnp.float32)
    b2 = 0.1 * jax.random.normal(k3, (H2,), dtype=jnp.float32)
    out2 = jax.block_until_ready(llmc_layer_norm(x2, w2, b2, eps, (H2,)))
    ref2 = llmc_layer_norm_ref(x2, w2, b2, eps, (H2,))
    assert jnp.max(jnp.abs(out2 - ref2)) < 1e-5

    print("KERNEL_OK")
</pallas_src>

<mosaic_0001>
module attributes {stable_mosaic.version = 11 : i64} {
  func.func @_layer_norm_kernel(%arg0: i32, %arg1: memref<4x128xf32, #tpu.memory_space<vmem>>, %arg2: memref<128x128xf32, #tpu.memory_space<vmem>>, %arg3: memref<2x128xf32, #tpu.memory_space<vmem>>, %arg4: memref<4x128xf32, #tpu.memory_space<vmem>>) attributes {dimension_semantics = [#tpu.dimension_semantics<parallel>], iteration_bounds = array<i64: 1>, scalar_prefetch = 0 : i64, scratch_operands = 0 : i64, tpu.core_type = #tpu.core_type<tc>, window_params = [{transform_indices = @transform_0, window_bounds = array<i64: 4, 128>}, {pipeline_mode = #tpu.pipeline_mode<synchronous>, transform_indices = @transform_1, window_bounds = array<i64: 128, 128>}, {pipeline_mode = #tpu.pipeline_mode<synchronous>, transform_indices = @transform_2, window_bounds = array<i64: 2, 128>}, {transform_indices = @transform_3, window_bounds = array<i64: 4, 128>}]} {
    %c0 = arith.constant 0 : index
    %c0_0 = arith.constant 0 : index
    %0 = vector.load %arg1[%c0, %c0_0] : memref<4x128xf32, #tpu.memory_space<vmem>>, vector<4x128xf32>
    %c0_1 = arith.constant 0 : index
    %c0_2 = arith.constant 0 : index
    %1 = vector.load %arg2[%c0_1, %c0_2] : memref<128x128xf32, #tpu.memory_space<vmem>>, vector<128x128xf32>
    %cst = arith.constant dense<0.000000e+00> : vector<4x128xf32>
    %2 = tpu.matmul %0, %1, %cst {dimension_numbers = #tpu.dot_dimension_numbers<[1], [0], [0], [1], [0, 0, 1, 1], [], []>} : vector<4x128xf32>, vector<128x128xf32>, vector<4x128xf32> -> vector<4x128xf32>
    %3 = arith.subf %0, %2 : vector<4x128xf32>
    %4 = arith.mulf %3, %3 : vector<4x128xf32>
    %cst_3 = arith.constant dense<0.000000e+00> : vector<4x128xf32>
    %5 = tpu.matmul %4, %1, %cst_3 {dimension_numbers = #tpu.dot_dimension_numbers<[1], [0], [0], [1], [0, 0, 1, 1], [], []>} : vector<4x128xf32>, vector<128x128xf32>, vector<4x128xf32> -> vector<4x128xf32>
    %cst_4 = arith.constant 9.99999974E-6 : f32
    %6 = vector.broadcast %cst_4 : f32 to vector<4x128xf32>
    %7 = arith.addf %5, %6 : vector<4x128xf32>
    %8 = math.rsqrt %7 : vector<4x128xf32>
    %9 = arith.mulf %3, %8 : vector<4x128xf32>
    %c0_5 = arith.constant 0 : index
    %c0_6 = arith.constant 0 : index
    %10 = vector.load %arg3[%c0_5, %c0_6] : memref<2x128xf32, #tpu.memory_space<vmem>>, vector<2x128xf32>
    %11 = vector.extract_strided_slice %10 {offsets = [0, 0], sizes = [1, 128], strides = [1, 1]} : vector<2x128xf32> to vector<1x128xf32>
    %12 = vector.broadcast %11 : vector<1x128xf32> to vector<4x128xf32>
    %13 = arith.mulf %9, %12 : vector<4x128xf32>
    %14 = vector.extract_strided_slice %10 {offsets = [1, 0], sizes = [1, 128], strides = [1, 1]} : vector<2x128xf32> to vector<1x128xf32>
    %15 = vector.broadcast %14 : vector<1x128xf32> to vector<4x128xf32>
    %16 = arith.addf %13, %15 : vector<4x128xf32>
    %c0_7 = arith.constant 0 : index
    %c0_8 = arith.constant 0 : index
    %17 = vector.load %arg4[%c0_7, %c0_8] : memref<4x128xf32, #tpu.memory_space<vmem>>, vector<4x128xf32>
    tpu.vector_store %arg4[%c0_7, %c0_8], %16 {strides = array<i32>} : memref<4x128xf32, #tpu.memory_space<vmem>>, vector<4x128xf32>,
    return
  }
  func.func @transform_0(%arg0: i32) -> (i32, i32) {
    %c0_i32 = arith.constant 0 : i32
    %c0_i32_0 = arith.constant 0 : i32
    return %arg0, %c0_i32 : i32, i32
  }
  func.func @transform_1(%arg0: i32) -> (i32, i32) {
    %c0_i32 = arith.constant 0 : i32
    %c0_i32_0 = arith.constant 0 : i32
    %c0_i32_1 = arith.constant 0 : i32
    return %c0_i32, %c0_i32_0 : i32, i32
  }
  func.func @transform_2(%arg0: i32) -> (i32, i32) {
    %c0_i32 = arith.constant 0 : i32
    %c0_i32_0 = arith.constant 0 : i32
    %c0_i32_1 = arith.constant 0 : i32
    return %c0_i32, %c0_i32_0 : i32, i32
  }
  func.func @transform_3(%arg0: i32) -> (i32, i32) {
    %c0_i32 = arith.constant 0 : i32
    %c0_i32_0 = arith.constant 0 : i32
    return %arg0, %c0_i32 : i32, i32
  }
}

</mosaic_0001>

<bundles_post_ra>
// kernel: tpu_custom_call.1
= control target key start
LH: loop header
LB: loop body
LE: loop exit
PB: predicated region body
PF: predicated region fallthrough
CT: control target
= control target key end

     0   :  { %8 = vsyncpa [#allocation3], 0  ;;  %s538_s0 = inlined_call_operand.hbm [shape: f32[4,128], index: 0, kind: input, shape index: {}]   ;;  %s539_s1 = inlined_call_operand.hbm [shape: f32[128,128], index: 1, kind: input, shape index: {}]   ;;  %s540_s2 = inlined_call_operand.vmem [shape: f32[2,128], index: 2, kind: input, shape index: {}]   ;;  %s541_s3 = inlined_call_operand.hbm [shape: f32[4,128], index: 3, kind: output, shape index: {}]  }
   0x1   :  { %9 = vsyncpa [#allocation6], 0 }
   0x2   :  { %10 = vsyncpa [#allocation4], 0  ;;  %s464_s12 = smov [#allocation2]   ;;  %s465_s14 = smov [#allocation5]  }
   0x3   :  { %s17_s13 = sshll.u32 %s464_s12, 4  ;;  %s26_s15 = sshll.u32 %s465_s14, 4  ;;  %s18_s13 = int_to_ptr.vmem [resolvable:$true] %s17_s13  ;;  %s492_s15 = int_to_ptr.vmem [resolvable:$true] %s26_s15 }
   0x4   :  { %s392_s18 = scalar_lea.hbm %s538_s0, 64 }
   0x5   :  { %p393_p0 = scmp.ne.s32.totalorder %s538_s0, %s392_s18  ;;  %p396_p1 = scmp.lt.u32.totalorder %s392_s18, %s538_s0 }
   0x7   :  { %p398_p2 = pnand %p396_p1, %p393_p0 }
   0x9   :  { %401 = shalt.err (!%p398_p2)
}
   0xa   :  { %s402_s23 = scalar_lea.vmem %s18_s13, 64  ;;  %p407_p4 = scmp.lt.s32.totalorder %s18_s13, %s18_s13 }
   0xb   :  { %p403_p3 = scmp.ne.s32.totalorder %s18_s13, %s402_s23  ;;  %p408_p5 = scmp.lt.s32.totalorder %s402_s23, %s402_s23 }
   0xd   :  { %p409_p6 = por %p408_p5, %p407_p4 }
   0xf   :  { %p410_p7 = pnand %p409_p6, %p403_p3 }
  0x11   :  { %413 = shalt.err (!%p410_p7)
}
  0x12   :  { %20 = dma.hbm_to_vmem [thread:$0]  %s538_s0, 64, %s18_s13, [#allocation3]  }
  0x13   :  { %s414_s28 = scalar_lea.hbm %s539_s1, 2048 }
  0x14   :  { %p415_p8 = scmp.ne.s32.totalorder %s539_s1, %s414_s28  ;;  %p418_p9 = scmp.lt.u32.totalorder %s414_s28, %s539_s1 }
  0x16   :  { %p420_p10 = pnand %p418_p9, %p415_p8 }
  0x18   :  { %423 = shalt.err (!%p420_p10)
}
  0x19   :  { %s424_s6 = scalar_lea.vmem %s492_s15, 2048  ;;  %p429_p12 = scmp.lt.s32.totalorder %s492_s15, %s492_s15 }
  0x1a   :  { %p425_p11 = scmp.ne.s32.totalorder %s492_s15, %s424_s6  ;;  %p430_p13 = scmp.lt.s32.totalorder %s424_s6, %s424_s6 }
  0x1c   :  { %p431_p0 = por %p430_p13, %p429_p12 }
  0x1e   :  { %p432_p1 = pnand %p431_p0, %p425_p11 }
  0x20   :  { %435 = shalt.err (!%p432_p1)
}
  0x21   :  { %s466_s0 = smov 128   ;;  %s467_s7 = smov 8  }
  0x22   :  { %32 = dma.hbm_to_vmem [thread:$0]  %s539_s1, 2048, %s492_s15, [#allocation6], %s466_s0, %s466_s0, %s467_s7  }
  0x23   :  { %458 = dma.done.wait [#allocation3], 64  }
  0x24   :  { %459 = vsyncadd [#allocation3], 4294967232 }
  0x25   :  { %460 = dma.done.wait [#allocation6], 2048  }
  0x26   :  { %461 = vsyncadd [#allocation6], 4294965248  ;;  %v468_v0 = vmov 0.0|0.0   ;;  %vm469_vm0 = vmmov 0   ;;  %v470_v1 = vmov 0.0   ;;  %v42_v2 = vld [vmem:[#allocation5] sm:$0xff]  ;;  %v203_v32 = vlaneseq }
  0x27   :  { %334 = vmatprep.subr.bf16.mxu0 %v468_v0  ;;  %296 = vmatprep.mubr.msk.f32.mxu0 %vm469_vm0, %v470_v1  ;;  %v43_v3 = vld [vmem:[#allocation5 + $0x8] sm:$0xff]  ;;  %v44_v4 = vld [vmem:[#allocation5 + $0x10] sm:$0xff]  ;;  %v45_v6 = vld [vmem:[#allocation5 + $0x18] sm:$0xff]  ;;  %s471_s11 = smov [#allocation7]  }
  0x28   :  { %358 = vmatprep.subr.bf16.mxu1 %v468_v0  ;;  %331 = vmatprep.mubr.msk.f32.mxu1 %vm469_vm0, %v470_v1  ;;  %v335_v5 = vpack.c.bf16 %v43_v3, %v42_v2  ;;  %v338_v7 = vpack.c.bf16 %v45_v6, %v44_v4  ;;  %v46_v8 = vld [vmem:[#allocation5 + $0x20] sm:$0xff]  ;;  %v47_v9 = vld [vmem:[#allocation5 + $0x28] sm:$0xff]  ;;  %v48_v11 = vld [vmem:[#allocation5 + $0x30] sm:$0xff]  ;;  %v204_v35 = vshrl.u32 %v203_v32, 7  ;;  %s220_s12 = sshll.u32 %s471_s11, 4  ;;  %s221_s12 = int_to_ptr.vmem [resolvable:$true] %s220_s12 }
  0x29   :  { %v341_v10 = vpack.c.bf16 %v47_v9, %v46_v8  ;;  %v49_v12 = vld [vmem:[#allocation5 + $0x38] sm:$0xff]  ;;  %v50_v14 = vld [vmem:[#allocation5 + $0x40] sm:$0xff]  ;;  %v51_v15 = vld [vmem:[#allocation5 + $0x48] sm:$0xff]  ;;  %s436_s13 = scalar_lea.vmem %s221_s12, 64  ;;  %p441_p3 = scmp.lt.s32.totalorder %s221_s12, %s221_s12 }
  0x2a   :  { %336 = vmatpush3.bf16.msra.mxu0 %v335_v5  ;;  %360 = vmatpush3.bf16.msra.mxu1 %v335_v5  ;;  %v344_v13 = vpack.c.bf16 %v49_v12, %v48_v11  ;;  %v347_v16 = vpack.c.bf16 %v51_v15, %v50_v14  ;;  %v52_v17 = vld [vmem:[#allocation5 + $0x50] sm:$0xff]  ;;  %v53_v18 = vld [vmem:[#allocation5 + $0x58] sm:$0xff]  ;;  %v54_v20 = vld [vmem:[#allocation5 + $0x60] sm:$0xff]  ;;  %v205_v36 = vsub.s32 0, %v204_v35  ;;  %v210_v38 = vsub.s32 1, %v204_v35  ;;  %p437_p2 = scmp.ne.s32.totalorder %s221_s12, %s436_s13  ;;  %p442_p4 = scmp.lt.s32.totalorder %s436_s13, %s436_s13 }
  0x2b   :  { %337 = vmatprep.subr.bf16.mxu0 %v468_v0  ;;  %361 = vmatprep.subr.bf16.mxu1 %v468_v0  ;;  %v350_v19 = vpack.c.bf16 %v53_v18, %v52_v17  ;;  %v55_v21 = vld [vmem:[#allocation5 + $0x68] sm:$0xff]  ;;  %v56_v23 = vld [vmem:[#allocation5 + $0x70] sm:$0xff]  ;;  %v57_v24 = vld [vmem:[#allocation5 + $0x78] sm:$0xff] }
  0x2c   :  { %v353_v22 = vpack.c.bf16 %v55_v21, %v54_v20  ;;  %v356_v25 = vpack.c.bf16 %v57_v24, %v56_v23  ;;  %v41_v26 = vld [vmem:[#allocation2] sm:$0xf]  ;;  %p443_p5 = por %p442_p4, %p441_p3 }
  0x2d   :  { %v202_v37 = vld [vmem:[%s540_s2] sm:$0x3] }
  0x2e   :  { %339 = vmatpush3.bf16.msra.mxu0 %v338_v7  ;;  %363 = vmatpush3.bf16.msra.mxu1 %v338_v7  ;;  %v206_v39 = vrot.slane %v202_v37, %v205_v36  ;;  %v211_v42 = vrot.slane %v202_v37, %v210_v38  ;;  %p444_p6 = pnand %p443_p5, %p437_p2 }
  0x2f   :  { %340 = vmatprep.subr.bf16.mxu0 %v468_v0  ;;  %364 = vmatprep.subr.bf16.mxu1 %v468_v0 }
  0x32   :  { %342 = vmatpush3.bf16.msra.mxu0 %v341_v10  ;;  %366 = vmatpush3.bf16.msra.mxu1 %v341_v10 }
  0x33   :  { %343 = vmatprep.subr.bf16.mxu0 %v468_v0  ;;  %367 = vmatprep.subr.bf16.mxu1 %v468_v0 }
  0x36   :  { %345 = vmatpush3.bf16.msra.mxu0 %v344_v13  ;;  %369 = vmatpush3.bf16.msra.mxu1 %v344_v13 }
  0x37   :  { %346 = vmatprep.subr.bf16.mxu0 %v468_v0  ;;  %370 = vmatprep.subr.bf16.mxu1 %v468_v0 }
  0x3a   :  { %348 = vmatpush3.bf16.msra.mxu0 %v347_v16  ;;  %372 = vmatpush3.bf16.msra.mxu1 %v347_v16 }
  0x3b   :  { %349 = vmatprep.subr.bf16.mxu0 %v468_v0  ;;  %373 = vmatprep.subr.bf16.mxu1 %v468_v0 }
  0x3e   :  { %351 = vmatpush3.bf16.msra.mxu0 %v350_v19  ;;  %375 = vmatpush3.bf16.msra.mxu1 %v350_v19 }
  0x3f   :  { %352 = vmatprep.subr.bf16.mxu0 %v468_v0  ;;  %376 = vmatprep.subr.bf16.mxu1 %v468_v0 }
  0x42   :  { %354 = vmatpush3.bf16.msra.mxu0 %v353_v22  ;;  %378 = vmatpush3.bf16.msra.mxu1 %v353_v22 }
  0x43   :  { %355 = vmatprep.subr.bf16.mxu0 %v468_v0  ;;  %379 = vmatprep.subr.bf16.mxu1 %v468_v0 }
  0x46   :  { %357 = vmatpush3.bf16.msra.mxu0 %v356_v25  ;;  %381 = vmatpush3.bf16.msra.mxu1 %v356_v25 }
  0x49   :  { %297 = vmatmul.mubr.f32.vlgmr.msra.gmra.mrb[0].mxu0 %v41_v26 }
 0x11c   :  { %v124_v27 = vpop.f32.mrb[0].mxu0 }
 0x11d   :  { %v128_v28 = vsub.f32 %v41_v26, %v124_v27  ;;  %v298_v29 = vpop.f32.mrb[1].mxu0 }
 0x11f   :  { %v129_v30 = vmul.f32 %v128_v28, %v128_v28 }
 0x121   :  { %332 = vmatmul.mubr.f32.vlgmr.msra.gmra.mrb[0].mxu1 %v129_v30 }
 0x1f4   :  { %v196_v31 = vpop.f32.mrb[0].mxu1 }
 0x1f5   :  { %v197_v33 = vadd.f32 1e-05, %v196_v31  ;;  %v333_v34 = vpop.f32.mrb[1].mxu1 }
 0x1f7   :  { %390 = vrsqrt.f32 %v197_v33 }
 0x201   :  { %v391_v40 = vpop.eup %390 }
 0x202   :  { %v201_v41 = vmul.f32 %v391_v40, %v128_v28 }
 0x204   :  { %v207_v43 = vmul.f32 %v206_v39, %v201_v41 }
 0x206   :  { %v212_v44 = vadd.f32 %v211_v42, %v207_v43 }
 0x208   :  { %213 = vst [vmem:[#allocation7] sm:$0xf] %v212_v44 }
 0x209   :  { %447 = shalt.err (!%p444_p6)
}
 0x20a   :  { %s448_s15 = scalar_lea.hbm %s541_s3, 64 }
 0x20b   :  { %p449_p7 = scmp.ne.s32.totalorder %s541_s3, %s448_s15  ;;  %p452_p8 = scmp.lt.u32.totalorder %s448_s15, %s541_s3 }
 0x20d   :  { %p454_p9 = pnand %p452_p8, %p449_p7 }
 0x20f   :  { %457 = shalt.err (!%p454_p9)
}
 0x210   :  { %223 = dma.vmem_to_hbm [thread:$0]  %s221_s12, 64, %s541_s3, [#allocation4]  }
 0x211   :  { %462 = dma.done.wait [#allocation4], 64  }
 0x212   :  { %463 = vsyncadd [#allocation4], 4294967232 }
 0x213   :  { %227 = vsyncpa [#allocation3], 1 }
 0x214   :  { %228 = vsyncpa [#allocation6], 1 }
 0x215   :  { %229 = vsyncpa [#allocation4], 1 }

</bundles_post_ra>
